<compile_context>
chip_gen: v7x
topology: tpu7x:2x2x1
jax: 0.10.0
libtpu: 0.0.40
codegen_flags: <defaults>
</compile_context>

<pallas_src>
import functools

import jax
import jax.numpy as jnp
from jax.experimental import pallas as pl
from jax.experimental.pallas import tpu as pltpu

# ---- synthetic config (the torch module reads these from `config`) ----
HISTORY_LEN = 2
IN_DIM = 37 * HISTORY_LEN      # 74
FC1 = 32
FC2 = 32
N_ACTIONS = 4
BN_EPS = 1e-5                  # nn.BatchNorm1d default

LANES = 128                    # every feature dim is zero-padded to one lane tile


def dqn_kernel(x_ref, w_ref, p_ref, q_ref):
    # x_ref: (B, 128)      bf16  -- flattened input, lanes 74..127 are zero
    # w_ref: (3, 128, 128) bf16  -- padded w1 / w2 / w3 (in, out) layout
    # p_ref: (8, 128)      f32   -- rows: b1, g1, be1, b2, g2, be2, b3, zeros
    # q_ref: (B, 128)      f32   -- Q values in lanes 0..3, zeros elsewhere
    x = x_ref[...]

    b1, g1, be1 = p_ref[0:1, :], p_ref[1:2, :], p_ref[2:3, :]
    b2, g2, be2 = p_ref[3:4, :], p_ref[4:5, :], p_ref[5:6, :]
    b3 = p_ref[6:7, :]

    def bn(h, g, be):
        # Training-mode BatchNorm1d (biased batch variance), folded into
        # a single scale/shift FMA. All math in f32 on the VPU.
        mu = jnp.mean(h, axis=0, keepdims=True)             # (1, 128)
        d = h - mu
        var = jnp.mean(d * d, axis=0, keepdims=True)        # (1, 128)
        scale = g * jax.lax.rsqrt(var + BN_EPS)              # (1, 128)
        shift = be - mu * scale                               # (1, 128)
        return h * scale + shift

    # --- fc1 -> ReLU -> BN1 (bf16 MXU operands, f32 accumulate) ---
    h1 = jnp.dot(x, w_ref[0], preferred_element_type=jnp.float32) + b1
    h1 = bn(jnp.maximum(h1, 0.0), g1, be1)

    # --- fc2 -> ReLU -> BN2 ---
    h2 = jnp.dot(h1.astype(jnp.bfloat16), w_ref[1],
                 preferred_element_type=jnp.float32) + b2
    h2 = bn(jnp.maximum(h2, 0.0), g2, be2)

    # --- fc3 -> Q : lane-dense (B, 128) store, real Q in lanes 0..3 ---
    q_ref[...] = jnp.dot(h2.astype(jnp.bfloat16), w_ref[2],
                         preferred_element_type=jnp.float32) + b3


@jax.jit
def dqn_forward(x, w_slab, p_slab):
    """x: (B, history_len, 37) or (B, 74) float32. Returns (B, 4) Q values."""
    b = x.shape[0]
    x = x.reshape(b, -1)
    # zero-pad features to 128 lanes, cast to bf16 for the MXU
    x = jnp.pad(x, ((0, 0), (0, LANES - x.shape[1]))).astype(jnp.bfloat16)

    vmem = pl.BlockSpec(memory_space=pltpu.MemorySpace.VMEM)
    q_pad = pl.pallas_call(
        dqn_kernel,
        out_shape=jax.ShapeDtypeStruct((b, LANES), jnp.float32),
        in_specs=[vmem, vmem, vmem],
        out_specs=vmem,
        cost_estimate=pl.CostEstimate(
            flops=3 * 2 * b * LANES * LANES,
            transcendentals=2 * LANES,
            bytes_accessed=(b * LANES * 2          # x (bf16)
                            + 3 * LANES * LANES * 2  # weight slab (bf16)
                            + 8 * LANES * 4          # param rows (f32)
                            + b * LANES * 4)),       # output (f32)
    )(x, w_slab, p_slab)
    return q_pad[:, :N_ACTIONS]


# ----------------------- parameter construction ------------------------------

def xavier_uniform(key, fan_in, fan_out):
    # matches nn.init.xavier_uniform_ on a (out, in) Linear weight;
    # stored transposed as (in, out).
    bound = (6.0 / (fan_in + fan_out)) ** 0.5
    return jax.random.uniform(key, (fan_in, fan_out), jnp.float32, -bound, bound)


def init_params(key):
    ks = jax.random.split(key, 6)

    def linear_bias(k, fan_in, fan_out):
        bound = 1.0 / (fan_in ** 0.5)   # PyTorch Linear default bias init
        return jax.random.uniform(k, (1, fan_out), jnp.float32, -bound, bound)

    return {
        "w1": xavier_uniform(ks[0], IN_DIM, FC1),
        "b1": linear_bias(ks[1], IN_DIM, FC1),
        "g1": jnp.ones((1, FC1), jnp.float32),    # BN weight init = 1
        "be1": jnp.zeros((1, FC1), jnp.float32),  # BN bias init = 0
        "w2": xavier_uniform(ks[2], FC1, FC2),
        "b2": linear_bias(ks[3], FC1, FC2),
        "g2": jnp.ones((1, FC2), jnp.float32),
        "be2": jnp.zeros((1, FC2), jnp.float32),
        "w3": xavier_uniform(ks[4], FC2, N_ACTIONS),
        "b3": linear_bias(ks[5], FC2, N_ACTIONS),
    }


def pack_params(params):
    """Pack the 11 parameters into one bf16 weight slab + one f32 row slab.

    All padding is zero so padded hidden/Q lanes stay exactly zero.
    """
    def pad_w(w, rows, cols):
        out = jnp.zeros((LANES, LANES), jnp.float32)
        return out.at[:rows, :cols].set(w)

    w_slab = jnp.stack([
        pad_w(params["w1"], IN_DIM, FC1),
        pad_w(params["w2"], FC1, FC2),
        pad_w(params["w3"], FC2, N_ACTIONS),
    ]).astype(jnp.bfloat16)                                   # (3, 128, 128)

    def pad_row(v, n):
        out = jnp.zeros((LANES,), jnp.float32)
        return out.at[:n].set(v.reshape(-1))

    p_slab = jnp.stack([
        pad_row(params["b1"], FC1), pad_row(params["g1"], FC1), pad_row(params["be1"], FC1),
        pad_row(params["b2"], FC2), pad_row(params["g2"], FC2), pad_row(params["be2"], FC2),
        pad_row(params["b3"], N_ACTIONS),
        jnp.zeros((LANES,), jnp.float32),
    ])                                                        # (8, 128) f32
    return w_slab, p_slab


# ------------------------------ reference ------------------------------------

def dqn_reference(x, p):
    """Pure-JAX reference with the same precision policy as the kernel:
    bf16-rounded matmul operands, f32 accumulation and f32 BN/ReLU math."""
    bf = lambda a: a.astype(jnp.bfloat16).astype(jnp.float32)

    def bn(h, g, be):
        mu = h.mean(0, keepdims=True)
        var = ((h - mu) ** 2).mean(0, keepdims=True)
        return (h - mu) * jax.lax.rsqrt(var + BN_EPS) * g + be

    x = x.reshape(x.shape[0], -1)
    h1 = jnp.maximum(bf(x) @ bf(p["w1"]) + p["b1"], 0.0)
    h1 = bn(h1, p["g1"], p["be1"])
    h2 = jnp.maximum(bf(h1) @ bf(p["w2"]) + p["b2"], 0.0)
    h2 = bn(h2, p["g2"], p["be2"])
    return bf(h2) @ bf(p["w3"]) + p["b3"]


# -------------------------------- main ----------------------------------------

if __name__ == "__main__":
    key = jax.random.PRNGKey(0)
    k_param, k_x = jax.random.split(key)
    params = init_params(k_param)
    w_slab, p_slab = pack_params(params)

    BATCH = 8
    # torch forward flattens (B, history_len, 37) -> (B, 74)
    x = jax.random.normal(k_x, (BATCH, HISTORY_LEN, 37), jnp.float32)

    q = dqn_forward(x, w_slab, p_slab)
    q = jax.block_until_ready(q)

    q_ref = dqn_reference(x, params)
    assert q.shape == (BATCH, N_ACTIONS)
    max_err = float(jnp.max(jnp.abs(q - q_ref)))
    assert jnp.allclose(q, q_ref, atol=2e-3, rtol=2e-3), (
        f"mismatch vs reference, max abs err = {max_err}")

    print("KERNEL_OK")
</pallas_src>

<mosaic_0001>
module attributes {stable_mosaic.version = 11 : i64} {
  func.func @dqn_kernel(%arg0: memref<8x128xbf16, #tpu.memory_space<vmem>>, %arg1: memref<3x128x128xbf16, #tpu.memory_space<vmem>>, %arg2: memref<8x128xf32, #tpu.memory_space<vmem>>, %arg3: memref<8x128xf32, #tpu.memory_space<vmem>>) attributes {dimension_semantics = [], scalar_prefetch = 0 : i64, scratch_operands = 0 : i64, tpu.core_type = #tpu.core_type<tc>} {
    %c0 = arith.constant 0 : index
    %c0_0 = arith.constant 0 : index
    %0 = vector.load %arg0[%c0, %c0_0] : memref<8x128xbf16, #tpu.memory_space<vmem>>, vector<8x128xbf16>
    %c0_1 = arith.constant 0 : index
    %c0_2 = arith.constant 0 : index
    %1 = vector.load %arg2[%c0_1, %c0_2] : memref<8x128xf32, #tpu.memory_space<vmem>>, vector<1x128xf32>
    %c1 = arith.constant 1 : index
    %c0_3 = arith.constant 0 : index
    %2 = vector.load %arg2[%c1, %c0_3] : memref<8x128xf32, #tpu.memory_space<vmem>>, vector<1x128xf32>
    %c2 = arith.constant 2 : index
    %c0_4 = arith.constant 0 : index
    %3 = vector.load %arg2[%c2, %c0_4] : memref<8x128xf32, #tpu.memory_space<vmem>>, vector<1x128xf32>
    %c3 = arith.constant 3 : index
    %c0_5 = arith.constant 0 : index
    %4 = vector.load %arg2[%c3, %c0_5] : memref<8x128xf32, #tpu.memory_space<vmem>>, vector<1x128xf32>
    %c4 = arith.constant 4 : index
    %c0_6 = arith.constant 0 : index
    %5 = vector.load %arg2[%c4, %c0_6] : memref<8x128xf32, #tpu.memory_space<vmem>>, vector<1x128xf32>
    %c5 = arith.constant 5 : index
    %c0_7 = arith.constant 0 : index
    %6 = vector.load %arg2[%c5, %c0_7] : memref<8x128xf32, #tpu.memory_space<vmem>>, vector<1x128xf32>
    %c6 = arith.constant 6 : index
    %c0_8 = arith.constant 0 : index
    %7 = vector.load %arg2[%c6, %c0_8] : memref<8x128xf32, #tpu.memory_space<vmem>>, vector<1x128xf32>
    %c0_9 = arith.constant 0 : index
    %c0_10 = arith.constant 0 : index
    %c0_11 = arith.constant 0 : index
    %8 = vector.load %arg1[%c0_9, %c0_10, %c0_11] : memref<3x128x128xbf16, #tpu.memory_space<vmem>>, vector<1x128x128xbf16>
    %9 = vector.shape_cast %8 : vector<1x128x128xbf16> to vector<128x128xbf16>
    %cst = arith.constant dense<0.000000e+00> : vector<8x128xf32>
    %10 = tpu.matmul %0, %9, %cst {dimension_numbers = #tpu.dot_dimension_numbers<[1], [0], [0], [1], [0, 0, 1, 1], [], []>} : vector<8x128xbf16>, vector<128x128xbf16>, vector<8x128xf32> -> vector<8x128xf32>
    %11 = vector.broadcast %1 : vector<1x128xf32> to vector<8x128xf32>
    %12 = arith.addf %10, %11 : vector<8x128xf32>
    %cst_12 = arith.constant 0.000000e+00 : f32
    %13 = vector.broadcast %cst_12 : f32 to vector<8x128xf32>
    %14 = arith.maximumf %12, %13 : vector<8x128xf32>
    %cst_13 = arith.constant dense<0.000000e+00> : vector<128xf32>
    %15 = vector.multi_reduction <add>, %14, %cst_13 [0] : vector<8x128xf32> to vector<128xf32>
    %16 = vector.shape_cast %15 : vector<128xf32> to vector<1x128xf32>
    %cst_14 = arith.constant 8.000000e+00 : f32
    %17 = vector.broadcast %cst_14 : f32 to vector<1x128xf32>
    %18 = arith.divf %16, %17 : vector<1x128xf32>
    %19 = vector.broadcast %18 : vector<1x128xf32> to vector<8x128xf32>
    %20 = arith.subf %14, %19 : vector<8x128xf32>
    %21 = arith.mulf %20, %20 : vector<8x128xf32>
    %cst_15 = arith.constant dense<0.000000e+00> : vector<128xf32>
    %22 = vector.multi_reduction <add>, %21, %cst_15 [0] : vector<8x128xf32> to vector<128xf32>
    %23 = vector.shape_cast %22 : vector<128xf32> to vector<1x128xf32>
    %cst_16 = arith.constant 8.000000e+00 : f32
    %24 = vector.broadcast %cst_16 : f32 to vector<1x128xf32>
    %25 = arith.divf %23, %24 : vector<1x128xf32>
    %cst_17 = arith.constant 9.99999974E-6 : f32
    %26 = vector.broadcast %cst_17 : f32 to vector<1x128xf32>
    %27 = arith.addf %25, %26 : vector<1x128xf32>
    %28 = math.rsqrt %27 : vector<1x128xf32>
    %29 = arith.mulf %2, %28 : vector<1x128xf32>
    %30 = arith.mulf %18, %29 : vector<1x128xf32>
    %31 = arith.subf %3, %30 : vector<1x128xf32>
    %32 = vector.broadcast %29 : vector<1x128xf32> to vector<8x128xf32>
    %33 = arith.mulf %14, %32 : vector<8x128xf32>
    %34 = vector.broadcast %31 : vector<1x128xf32> to vector<8x128xf32>
    %35 = arith.addf %33, %34 : vector<8x128xf32>
    %36 = arith.truncf %35 : vector<8x128xf32> to vector<8x128xbf16>
    %c1_18 = arith.constant 1 : index
    %c0_19 = arith.constant 0 : index
    %c0_20 = arith.constant 0 : index
    %37 = vector.load %arg1[%c1_18, %c0_19, %c0_20] : memref<3x128x128xbf16, #tpu.memory_space<vmem>>, vector<1x128x128xbf16>
    %38 = vector.shape_cast %37 : vector<1x128x128xbf16> to vector<128x128xbf16>
    %cst_21 = arith.constant dense<0.000000e+00> : vector<8x128xf32>
    %39 = tpu.matmul %36, %38, %cst_21 {dimension_numbers = #tpu.dot_dimension_numbers<[1], [0], [0], [1], [0, 0, 1, 1], [], []>} : vector<8x128xbf16>, vector<128x128xbf16>, vector<8x128xf32> -> vector<8x128xf32>
    %40 = vector.broadcast %4 : vector<1x128xf32> to vector<8x128xf32>
    %41 = arith.addf %39, %40 : vector<8x128xf32>
    %cst_22 = arith.constant 0.000000e+00 : f32
    %42 = vector.broadcast %cst_22 : f32 to vector<8x128xf32>
    %43 = arith.maximumf %41, %42 : vector<8x128xf32>
    %cst_23 = arith.constant dense<0.000000e+00> : vector<128xf32>
    %44 = vector.multi_reduction <add>, %43, %cst_23 [0] : vector<8x128xf32> to vector<128xf32>
    %45 = vector.shape_cast %44 : vector<128xf32> to vector<1x128xf32>
    %cst_24 = arith.constant 8.000000e+00 : f32
    %46 = vector.broadcast %cst_24 : f32 to vector<1x128xf32>
    %47 = arith.divf %45, %46 : vector<1x128xf32>
    %48 = vector.broadcast %47 : vector<1x128xf32> to vector<8x128xf32>
    %49 = arith.subf %43, %48 : vector<8x128xf32>
    %50 = arith.mulf %49, %49 : vector<8x128xf32>
    %cst_25 = arith.constant dense<0.000000e+00> : vector<128xf32>
    %51 = vector.multi_reduction <add>, %50, %cst_25 [0] : vector<8x128xf32> to vector<128xf32>
    %52 = vector.shape_cast %51 : vector<128xf32> to vector<1x128xf32>
    %cst_26 = arith.constant 8.000000e+00 : f32
    %53 = vector.broadcast %cst_26 : f32 to vector<1x128xf32>
    %54 = arith.divf %52, %53 : vector<1x128xf32>
    %cst_27 = arith.constant 9.99999974E-6 : f32
    %55 = vector.broadcast %cst_27 : f32 to vector<1x128xf32>
    %56 = arith.addf %54, %55 : vector<1x128xf32>
    %57 = math.rsqrt %56 : vector<1x128xf32>
    %58 = arith.mulf %5, %57 : vector<1x128xf32>
    %59 = arith.mulf %47, %58 : vector<1x128xf32>
    %60 = arith.subf %6, %59 : vector<1x128xf32>
    %61 = vector.broadcast %58 : vector<1x128xf32> to vector<8x128xf32>
    %62 = arith.mulf %43, %61 : vector<8x128xf32>
    %63 = vector.broadcast %60 : vector<1x128xf32> to vector<8x128xf32>
    %64 = arith.addf %62, %63 : vector<8x128xf32>
    %65 = arith.truncf %64 : vector<8x128xf32> to vector<8x128xbf16>
    %c2_28 = arith.constant 2 : index
    %c0_29 = arith.constant 0 : index
    %c0_30 = arith.constant 0 : index
    %66 = vector.load %arg1[%c2_28, %c0_29, %c0_30] : memref<3x128x128xbf16, #tpu.memory_space<vmem>>, vector<1x128x128xbf16>
    %67 = vector.shape_cast %66 : vector<1x128x128xbf16> to vector<128x128xbf16>
    %cst_31 = arith.constant dense<0.000000e+00> : vector<8x128xf32>
    %68 = tpu.matmul %65, %67, %cst_31 {dimension_numbers = #tpu.dot_dimension_numbers<[1], [0], [0], [1], [0, 0, 1, 1], [], []>} : vector<8x128xbf16>, vector<128x128xbf16>, vector<8x128xf32> -> vector<8x128xf32>
    %69 = vector.broadcast %7 : vector<1x128xf32> to vector<8x128xf32>
    %70 = arith.addf %68, %69 : vector<8x128xf32>
    %c0_32 = arith.constant 0 : index
    %c0_33 = arith.constant 0 : index
    %71 = vector.load %arg3[%c0_32, %c0_33] : memref<8x128xf32, #tpu.memory_space<vmem>>, vector<8x128xf32>
    tpu.vector_store %arg3[%c0_32, %c0_33], %70 {strides = array<i32>} : memref<8x128xf32, #tpu.memory_space<vmem>>, vector<8x128xf32>,
    return
  }
}

</mosaic_0001>

<bundles_post_ra>
// kernel: dqn_forward.1
= control target key start
LH: loop header
LB: loop body
LE: loop exit
PB: predicated region body
PF: predicated region fallthrough
CT: control target
= control target key end

     0   :  { %8 = vsyncpa [#allocation3], 0  ;;  %s607_s12 = smov [#allocation2]   ;;  %s707_s0 = inlined_call_operand.vmem [shape: bf16[8,128], index: 0, kind: input, shape index: {}]   ;;  %s708_s1 = inlined_call_operand.hbm [shape: bf16[3,128,128], index: 1, kind: input, shape index: {}]   ;;  %s709_s2 = inlined_call_operand.vmem [shape: f32[8,128], index: 2, kind: input, shape index: {}]   ;;  %s710_s3 = inlined_call_operand.vmem [shape: f32[8,128], index: 3, kind: output, shape index: {}]  }
   0x1   :  { %s16_s13 = sshll.u32 %s607_s12, 4  ;;  %s583_s16 = scalar_lea.hbm %s708_s1, 3072  ;;  %s17_s13 = int_to_ptr.vmem [resolvable:$true] %s16_s13 }
   0x2   :  { %p584_p0 = scmp.ne.s32.totalorder %s708_s1, %s583_s16  ;;  %p587_p1 = scmp.lt.u32.totalorder %s583_s16, %s708_s1 }
   0x4   :  { %p589_p2 = pnand %p587_p1, %p584_p0 }
   0x6   :  { %592 = shalt.err (!%p589_p2)
}
   0x7   :  { %s593_s21 = scalar_lea.vmem %s17_s13, 3072  ;;  %p598_p4 = scmp.lt.s32.totalorder %s17_s13, %s17_s13 }
   0x8   :  { %p594_p3 = scmp.ne.s32.totalorder %s17_s13, %s593_s21  ;;  %p599_p5 = scmp.lt.s32.totalorder %s593_s21, %s593_s21 }
   0xa   :  { %p600_p6 = por %p599_p5, %p598_p4 }
   0xc   :  { %p601_p7 = pnand %p600_p6, %p594_p3 }
   0xe   :  { %604 = shalt.err (!%p601_p7)
}
   0xf   :  { %s608_s22 = smov 64   ;;  %s609_s23 = smov 4  }
  0x10   :  { %22 = dma.hbm_to_vmem [thread:$0]  %s708_s1, 3072, %s17_s13, [#allocation3], %s608_s22, %s608_s22, %s609_s23  }
  0x11   :  { %605 = dma.done.wait [#allocation3], 3072  }
  0x12   :  { %606 = vsyncadd [#allocation3], 4294964224  ;;  %v610_v0 = vmov 0.0   ;;  %vm611_vm0 = vmmov 0   ;;  %v555_v1 = vld [vmem:[#allocation2] sm:$0xff]   ;;  %v556_v2 = vld [vmem:[#allocation2 + $0x8] sm:$0xff]   ;;  %v168_v42 = vlaneseq }
  0x13   :  { %490 = vmatprep.subr.bf16.mxu0 %v610_v0  ;;  %506 = vmatprep.mubr.msk.bf16.mxu0 %vm611_vm0, %v610_v0  ;;  %v557_v3 = vld [vmem:[#allocation2 + $0x10] sm:$0xff]   ;;  %v558_v4 = vld [vmem:[#allocation2 + $0x18] sm:$0xff]   ;;  %v559_v5 = vld [vmem:[#allocation2 + $0x20] sm:$0xff]  }
  0x14   :  { %510 = vmatprep.subr.bf16.mxu1 %v610_v0  ;;  %526 = vmatprep.mubr.msk.bf16.mxu1 %vm611_vm0, %v610_v0  ;;  %v560_v6 = vld [vmem:[#allocation2 + $0x28] sm:$0xff]   ;;  %v561_v7 = vld [vmem:[#allocation2 + $0x30] sm:$0xff]   ;;  %v562_v8 = vld [vmem:[#allocation2 + $0x38] sm:$0xff]   ;;  %v169_v43 = vshrl.u32 %v168_v42, 7 }
  0x15   :  { %491 = vmatpush3.bf16.msra.mxu0 %v555_v1  ;;  %v29_v9 = vld [vmem:[%s707_s0] sm:$0xf]  ;;  %v564_v11 = vld [vmem:[#allocation2 + $0x48] sm:$0xff]   ;;  %v565_v12 = vld [vmem:[#allocation2 + $0x50] sm:$0xff]  }
  0x16   :  { %492 = vmatprep.subr.bf16.mxu0 %v610_v0  ;;  %v563_v10 = vld [vmem:[#allocation2 + $0x40] sm:$0xff]   ;;  %v566_v13 = vld [vmem:[#allocation2 + $0x58] sm:$0xff]   ;;  %v568_v15 = vld [vmem:[#allocation2 + $0x68] sm:$0xff]   ;;  %v676_v45 = vsub.s32 0, %v169_v43 }
  0x17   :  { %511 = vmatpush3.bf16.msra.mxu1 %v563_v10  ;;  %v567_v14 = vld [vmem:[#allocation2 + $0x60] sm:$0xff]   ;;  %v569_v16 = vld [vmem:[#allocation2 + $0x70] sm:$0xff]   ;;  %v570_v17 = vld [vmem:[#allocation2 + $0x78] sm:$0xff]  }
  0x18   :  { %512 = vmatprep.subr.bf16.mxu1 %v610_v0  ;;  %v436_v18 = vld [vmem:[%s709_s2] ss:$0 sm:$0xff]  ;;  %v31_v44 = vld [vmem:[%s709_s2 + $0x1] sm:$0x1]  ;;  %v32_v48 = vld [vmem:[%s709_s2 + $0x2] sm:$0x1] }
  0x19   :  { %493 = vmatpush3.bf16.msra.mxu0 %v556_v2  ;;  %v571_v56 = vld [vmem:[#allocation2 + $0x80] sm:$0xff]   ;;  %v572_v57 = vld [vmem:[#allocation2 + $0x88] sm:$0xff]   ;;  %v573_v58 = vld [vmem:[#allocation2 + $0x90] sm:$0xff]  }
  0x1a   :  { %494 = vmatprep.subr.bf16.mxu0 %v610_v0  ;;  %v574_v59 = vld [vmem:[#allocation2 + $0x98] sm:$0xff]   ;;  %v575_v60 = vld [vmem:[#allocation2 + $0xa0] sm:$0xff]   ;;  %v576_v61 = vld [vmem:[#allocation2 + $0xa8] sm:$0xff]  }
  0x1b   :  { %513 = vmatpush3.bf16.msra.mxu1 %v564_v11  ;;  %v577_v62 = vld [vmem:[#allocation2 + $0xb0] sm:$0xff]   ;;  %v578_v63 = vld [vmem:[#allocation2 + $0xb8] sm:$0xff]   ;;  %v445_v1 = vld [vmem:[%s709_s2 + $0x3] ss:$0 sm:$0xff] }
  0x1c   :  { %514 = vmatprep.subr.bf16.mxu1 %v610_v0 }
  0x1d   :  { %495 = vmatpush3.bf16.msra.mxu0 %v557_v3 }
  0x1e   :  { %496 = vmatprep.subr.bf16.mxu0 %v610_v0 }
  0x1f   :  { %515 = vmatpush3.bf16.msra.mxu1 %v565_v12 }
  0x20   :  { %516 = vmatprep.subr.bf16.mxu1 %v610_v0 }
  0x21   :  { %497 = vmatpush3.bf16.msra.mxu0 %v558_v4 }
  0x22   :  { %498 = vmatprep.subr.bf16.mxu0 %v610_v0 }
  0x23   :  { %517 = vmatpush3.bf16.msra.mxu1 %v566_v13 }
  0x24   :  { %518 = vmatprep.subr.bf16.mxu1 %v610_v0 }
  0x25   :  { %499 = vmatpush3.bf16.msra.mxu0 %v559_v5 }
  0x26   :  { %500 = vmatprep.subr.bf16.mxu0 %v610_v0 }
  0x27   :  { %519 = vmatpush3.bf16.msra.mxu1 %v567_v14 }
  0x28   :  { %520 = vmatprep.subr.bf16.mxu1 %v610_v0 }
  0x29   :  { %501 = vmatpush3.bf16.msra.mxu0 %v560_v6 }
  0x2a   :  { %502 = vmatprep.subr.bf16.mxu0 %v610_v0 }
  0x2b   :  { %521 = vmatpush3.bf16.msra.mxu1 %v568_v15 }
  0x2c   :  { %522 = vmatprep.subr.bf16.mxu1 %v610_v0 }
  0x2d   :  { %503 = vmatpush3.bf16.msra.mxu0 %v561_v7 }
  0x2e   :  { %504 = vmatprep.subr.bf16.mxu0 %v610_v0 }
  0x2f   :  { %523 = vmatpush3.bf16.msra.mxu1 %v569_v16 }
  0x30   :  { %524 = vmatprep.subr.bf16.mxu1 %v610_v0 }
  0x31   :  { %505 = vmatpush3.bf16.msra.mxu0 %v562_v8 }
  0x32   :  { %530 = vmatprep.subr.bf16.mxu0 %v610_v0 }
  0x33   :  { %525 = vmatpush3.bf16.msra.mxu1 %v570_v17 }
  0x34   :  { %507 = vmatmul.mubr.bf16.vlgmr.msra.gmra.mrb[0].mxu0 %v29_v9 }
  0x35   :  { %546 = vmatprep.mubr.msk.bf16.mxu0 %vm611_vm0, %v610_v0  ;;  %531 = vmatpush3.bf16.msra.mxu0 %v571_v56 }
  0x36   :  { %532 = vmatprep.subr.bf16.mxu0 %v610_v0 }
  0x39   :  { %533 = vmatpush3.bf16.msra.mxu0 %v572_v57 }
  0x3a   :  { %534 = vmatprep.subr.bf16.mxu0 %v610_v0 }
  0x3d   :  { %535 = vmatpush3.bf16.msra.mxu0 %v573_v58 }
  0x3e   :  { %536 = vmatprep.subr.bf16.mxu0 %v610_v0 }
  0x41   :  { %537 = vmatpush3.bf16.msra.mxu0 %v574_v59 }
  0x42   :  { %538 = vmatprep.subr.bf16.mxu0 %v610_v0 }
  0x45   :  { %539 = vmatpush3.bf16.msra.mxu0 %v575_v60 }
  0x46   :  { %540 = vmatprep.subr.bf16.mxu0 %v610_v0 }
  0x49   :  { %541 = vmatpush3.bf16.msra.mxu0 %v576_v61 }
  0x4a   :  { %542 = vmatprep.subr.bf16.mxu0 %v610_v0 }
  0x4d   :  { %543 = vmatpush3.bf16.msra.mxu0 %v577_v62 }
  0x4e   :  { %544 = vmatprep.subr.bf16.mxu0 %v610_v0 }
  0x51   :  { %545 = vmatpush3.bf16.msra.mxu0 %v578_v63 }
 0x107   :  { %v139_v19 = vpop.f32.mrb[0].mxu0 }
 0x108   :  { %v140_v20 = vadd.f32 %v436_v18, %v139_v19  ;;  %v508_v21 = vpop.f32.mrb[1].mxu0 }
 0x109   :  { %v142_v22 = vpop.f32.mrb[2].mxu0 }
 0x10a   :  { %v145_v23 = vmax.f32 %v140_v20, 0.0  ;;  %v509_v24 = vpop.f32.mrb[3].mxu0 }
 0x10b   :  { %v34_v24 = vld [vmem:[%s709_s2 + $0x4] sm:$0x1] }
 0x10c   :  { %v146_v25 = vrot.slane %v145_v23, 4 }
 0x10e   :  { %v147_v26 = vadd.f32 %v146_v25, %v145_v23 }
 0x110   :  { %v148_v27 = vrot.slane %v147_v26, 2 }
 0x112   :  { %v149_v28 = vadd.f32 %v148_v27, %v147_v26  ;;  %v35_v27 = vld [vmem:[%s709_s2 + $0x5] sm:$0x1] }
 0x114   :  { %v150_v29 = vrot.slane %v149_v28, 1 }
 0x116   :  { %v151_v30 = vadd.f32 %v150_v29, %v149_v28 }
 0x118   :  { %v153_v31 = vmul.f32 0.125, %v151_v30 }
 0x11a   :  { %v154_v32 = vsub.f32 %v145_v23, %v153_v31 }
 0x11c   :  { %v155_v33 = vmul.f32 %v154_v32, %v154_v32 }
 0x11e   :  { %v156_v34 = vrot.slane %v155_v33, 4 }
 0x120   :  { %v157_v35 = vadd.f32 %v156_v34, %v155_v33 }
 0x122   :  { %v158_v36 = vrot.slane %v157_v35, 2 }
 0x124   :  { %v159_v37 = vadd.f32 %v158_v36, %v157_v35  ;;  %v454_v35 = vld [vmem:[%s709_s2 + $0x6] ss:$0 sm:$0xff] }
 0x126   :  { %v160_v38 = vrot.slane %v159_v37, 1 }
 0x128   :  { %v161_v39 = vadd.f32 %v160_v38, %v159_v37 }
 0x12a   :  { %v162_v40 = vmul.f32 0.125, %v161_v39 }
 0x12c   :  { %v163_v41 = vadd.f32 1e-05, %v162_v40 }
 0x12e   :  { %579 = vrsqrt.f32 %v163_v41 }
 0x138   :  { %v580_v46 = vpop.eup %579 }
 0x139   :  { %v165_v47 = vmul.f32 %v580_v46, %v31_v44 }
 0x13b   :  { %v166_v49 = vmul.f32 %v165_v47, %v153_v31  ;;  %v171_v50 = vrot.slane %v165_v47, %v676_v45 }
 0x13d   :  { %v167_v51 = vsub.f32 %v32_v48, %v166_v49  ;;  %v172_v52 = vmul.f32 %v171_v50, %v145_v23 }
 0x13f   :  { %v176_v53 = vrot.slane %v167_v51, %v676_v45 }
 0x141   :  { %v177_v54 = vadd.f32 %v176_v53, %v172_v52 }
 0x143   :  { %v178_v55 = vpack.c.bf16 %v177_v54, %v177_v54 }
 0x145   :  { %527 = vmatmul.mubr.bf16.vlgmr.msra.gmra.mrb[0].mxu1 %v178_v55 }
 0x218   :  { %v282_v2 = vpop.f32.mrb[0].mxu1 }
 0x219   :  { %v283_v3 = vadd.f32 %v445_v1, %v282_v2  ;;  %v528_v4 = vpop.f32.mrb[1].mxu1 }
 0x21a   :  { %v285_v5 = vpop.f32.mrb[2].mxu1 }
 0x21b   :  { %v288_v6 = vmax.f32 %v283_v3, 0.0  ;;  %v529_v7 = vpop.f32.mrb[3].mxu1 }
 0x21d   :  { %v289_v8 = vrot.slane %v288_v6, 4 }
 0x21f   :  { %v290_v9 = vadd.f32 %v289_v8, %v288_v6 }
 0x221   :  { %v291_v10 = vrot.slane %v290_v9, 2 }
 0x223   :  { %v292_v11 = vadd.f32 %v291_v10, %v290_v9 }
 0x225   :  { %v293_v12 = vrot.slane %v292_v11, 1 }
 0x227   :  { %v294_v13 = vadd.f32 %v293_v12, %v292_v11 }
 0x229   :  { %v295_v14 = vmul.f32 0.125, %v294_v13 }
 0x22b   :  { %v296_v15 = vsub.f32 %v288_v6, %v295_v14 }
 0x22d   :  { %v297_v0 = vmul.f32 %v296_v15, %v296_v15 }
 0x22f   :  { %v298_v16 = vrot.slane %v297_v0, 4 }
 0x231   :  { %v299_v17 = vadd.f32 %v298_v16, %v297_v0 }
 0x233   :  { %v300_v18 = vrot.slane %v299_v17, 2 }
 0x235   :  { %v301_v19 = vadd.f32 %v300_v18, %v299_v17 }
 0x237   :  { %v302_v20 = vrot.slane %v301_v19, 1 }
 0x239   :  { %v303_v21 = vadd.f32 %v302_v20, %v301_v19 }
 0x23b   :  { %v304_v22 = vmul.f32 0.125, %v303_v21 }
 0x23d   :  { %v305_v23 = vadd.f32 1e-05, %v304_v22 }
 0x23f   :  { %581 = vrsqrt.f32 %v305_v23 }
 0x249   :  { %v582_v25 = vpop.eup %581 }
 0x24a   :  { %v307_v26 = vmul.f32 %v582_v25, %v34_v24 }
 0x24c   :  { %v308_v28 = vmul.f32 %v307_v26, %v295_v14  ;;  %v313_v29 = vrot.slane %v307_v26, %v676_v45 }
 0x24e   :  { %v309_v30 = vsub.f32 %v35_v27, %v308_v28  ;;  %v314_v31 = vmul.f32 %v313_v29, %v288_v6 }
 0x250   :  { %v318_v32 = vrot.slane %v309_v30, %v676_v45 }
 0x252   :  { %v319_v33 = vadd.f32 %v318_v32, %v314_v31 }
 0x254   :  { %v320_v34 = vpack.c.bf16 %v319_v33, %v319_v33 }
 0x256   :  { %547 = vmatmul.mubr.bf16.vlgmr.msra.gmra.mrb[4].mxu0 %v320_v34 }
 0x329   :  { %v424_v36 = vpop.f32.mrb[4].mxu0 }
 0x32a   :  { %v425_v37 = vadd.f32 %v454_v35, %v424_v36  ;;  %v548_v38 = vpop.f32.mrb[5].mxu0 }
 0x32b   :  { %v427_v39 = vpop.f32.mrb[6].mxu0 }
 0x32c   :  { %430 = vst [vmem:[%s710_s3] sm:$0xff] %v425_v37  ;;  %v549_v40 = vpop.f32.mrb[7].mxu0 }
 0x32d   :  { %435 = vsyncpa [#allocation3], 1 }

</bundles_post_ra>
